<compile_context>
chip_gen: v5e
topology: v5e:2x2
jax: 0.10.0
libtpu: 0.0.40
codegen_flags: <defaults>
</compile_context>

<pallas_src>
import functools

import jax
import jax.numpy as jnp
import numpy as np
from jax.experimental import pallas as pl
from jax.experimental.pallas import tpu as pltpu

M_MODELS = 3     # ensemble members (>1 so compute_uncertainty is True)
N_IMAGES = 2     # number of "images" (molecules) in the batch
N_ATOMS = 16     # total atoms across the batch
D_FEAT = 32      # per-atom feature width
H_HIDDEN = 32    # hidden width of the synthetic potential
F_DIM = 3        # physical force components
F_LANES = 8      # padded force lane width (3 real + 5 zero lanes)

STAT_LANES = 128  # stats slab lane width (lane-dense -> unmasked writeback)

# Column-oriented per-image stats, stored at stats[0:B, col].
(COL_E_MEAN, COL_E_VAR, COL_E_SD, COL_F_VAR, COL_F_SD,
 COL_E_AE, COL_E_SE, COL_F_AE, COL_F_SE, COL_E_MAX, COL_E_MIN) = range(11)
# Row-oriented per-image stats, stored at stats[row, 0:B].
ROW_F_MAXE = 8
ROW_F_MINE = 9
# Ensemble-mean forces packed at stats[0:N, FMEAN_LANE0 : FMEAN_LANE0+F_LANES].
FMEAN_LANE0 = 16


def _ensemble_kernel(x_ref, rhs_ref, bias_ref, p_ref, idx_row_ref, idx_col_ref,
                     de_ref, df_ref, stats_ref, zs_ref, *, mh, num_images):
    N, _ = x_ref.shape
    WIDE = rhs_ref.shape[1]
    M = p_ref.shape[1]
    B = num_images
    R = stats_ref.shape[0]
    inv_m = 1.0 / M
    inv_mm1 = 1.0 / (M - 1)
    inv_f = 1.0 / F_DIM

    # ---------- one wide matmul: energy hidden layer + all M force heads ----
    z = jnp.dot(x_ref[...], rhs_ref[...],
                preferred_element_type=jnp.float32) + bias_ref[...]  # (N, WIDE)
    # Park z in VMEM scratch so the member force blocks can be re-read as
    # ref lane-slices (robust unaligned access path).
    zs_ref[...] = z

    # ---------- force ensemble statistics (per atom) ----------
    f_mean = zs_ref[:, mh:mh + F_LANES]
    for m in range(1, M):
        f_mean = f_mean + zs_ref[:, mh + m * F_LANES: mh + (m + 1) * F_LANES]
    f_mean = f_mean * inv_m                               # (N, F_LANES), pads 0

    var_comp = jnp.zeros_like(f_mean)
    for m in range(M):
        d = zs_ref[:, mh + m * F_LANES: mh + (m + 1) * F_LANES] - f_mean
        var_comp = var_comp + d * d
    var_comp = var_comp * inv_mm1                         # unbiased variance

    f_diff = f_mean - df_ref[...]                         # (N, F_LANES), pads 0
    f_abs = jnp.abs(f_diff)
    f_sq = f_diff * f_diff

    v_col = jnp.sum(var_comp, axis=1, keepdims=True)      # (N, 1) sum over comps
    a_col = jnp.sum(f_abs, axis=1, keepdims=True)
    s_col = jnp.sum(f_sq, axis=1, keepdims=True)          # squared error norm

    # ---------- one fused per-image segment-sum matmul ----------
    lane_n = jax.lax.broadcasted_iota(jnp.int32, (N, WIDE), 1)
    seg_rhs = jnp.where(lane_n < mh, jnp.maximum(z, 0.0), 0.0)   # relu hidden
    seg_rhs = jnp.where(lane_n == mh, v_col, seg_rhs)            # spare lanes
    seg_rhs = jnp.where(lane_n == mh + 1, a_col, seg_rhs)
    seg_rhs = jnp.where(lane_n == mh + 2, s_col, seg_rhs)

    # 8-row one-hot: rows >= B are all-zero automatically (idx in [0, B)).
    onehot = (idx_row_ref[...] ==
              jax.lax.broadcasted_iota(jnp.int32, (8, N), 0)
              ).astype(jnp.float32)                              # (8, N)
    seg = jnp.dot(onehot, seg_rhs, preferred_element_type=jnp.float32)  # (8, WIDE)

    counts = jnp.maximum(jnp.sum(onehot, axis=1, keepdims=True), 1.0)   # (8, 1)
    inv_counts = pl.reciprocal(counts, approx=True)

    # per-image per-member energies: p_ref is the w2-scaled block indicator,
    # zero-padded to WIDE rows so the spare-lane columns cannot leak in.
    e_img = jnp.dot(seg, p_ref[...], preferred_element_type=jnp.float32)  # (8, M)

    lane8 = jax.lax.broadcasted_iota(jnp.int32, (8, WIDE), 1)
    f_var_img = jnp.sum(jnp.where(lane8 == mh, seg, 0.0),
                        axis=1, keepdims=True) * inv_counts * inv_f
    f_ae_img = jnp.sum(jnp.where(lane8 == mh + 1, seg, 0.0),
                       axis=1, keepdims=True) * inv_counts * inv_f
    f_se_img = jnp.sum(jnp.where(lane8 == mh + 2, seg, 0.0),
                       axis=1, keepdims=True) * inv_counts * inv_f
    f_sd_img = jnp.sqrt(f_var_img)

    # ---------- energy ensemble statistics ----------
    e_mean = jnp.mean(e_img, axis=1, keepdims=True)       # (8, 1)
    e_c = e_img - e_mean
    e_var = jnp.sum(e_c * e_c, axis=1, keepdims=True) * inv_mm1
    e_sd = jnp.sqrt(e_var)
    row_m = jax.lax.broadcasted_iota(jnp.int32, (8, M), 0)
    e_max = jnp.max(jnp.where(row_m < B, e_img, -jnp.inf)).reshape(1, 1)
    e_min = jnp.min(jnp.where(row_m < B, e_img, jnp.inf)).reshape(1, 1)

    # ---------- error metrics vs. reference labels ----------
    e_diff = e_mean - de_ref[...]                          # (8, 1), rows>=B are 0
    e_ae = jnp.abs(e_diff)
    e_se = e_diff * e_diff

    mask_nb = (idx_col_ref[...] ==
               jax.lax.broadcasted_iota(jnp.int32, (N, B), 1))        # (N, B)
    f_maxe = jnp.sqrt(jnp.max(jnp.where(mask_nb, s_col, -jnp.inf),
                              axis=0, keepdims=True))      # (1, B)
    f_mine = jnp.sqrt(jnp.min(jnp.where(mask_nb, s_col, jnp.inf),
                              axis=0, keepdims=True))      # (1, B)

    # ---------- pack everything into the lane-dense stats slab ----------
    lane_s = jax.lax.broadcasted_iota(jnp.int32, (8, STAT_LANES), 1)
    canvas = jnp.zeros((8, STAT_LANES), jnp.float32)
    for c, v in ((COL_E_MEAN, e_mean), (COL_E_VAR, e_var), (COL_E_SD, e_sd),
                 (COL_F_VAR, f_var_img), (COL_F_SD, f_sd_img),
                 (COL_E_AE, e_ae), (COL_E_SE, e_se),
                 (COL_F_AE, f_ae_img), (COL_F_SE, f_se_img),
                 (COL_E_MAX, e_max), (COL_E_MIN, e_min)):
        canvas = jnp.where(lane_s == c, v, canvas)
    stats_ref[0:8, :] = canvas                                     # aligned vst
    stats_ref[8:R, :] = jnp.zeros((R - 8, STAT_LANES), jnp.float32)
    stats_ref[ROW_F_MAXE:ROW_F_MAXE + 1, 0:B] = f_maxe
    stats_ref[ROW_F_MINE:ROW_F_MINE + 1, 0:B] = f_mine
    stats_ref[0:N, FMEAN_LANE0:FMEAN_LANE0 + F_LANES] = f_mean


def prepare_ensemble_params(w1, b1, w2, wf):
    """Per-model weight preprocessing, hoisted out of the forward pass."""
    M, D, H = w1.shape
    MH = M * H
    wide = ((MH + M * F_LANES + 127) // 128) * 128
    w1c = jnp.transpose(w1, (1, 0, 2)).reshape(D, MH)
    rhs = jnp.zeros((D, wide), jnp.float32).at[:, :MH].set(w1c)
    for m in range(M):
        rhs = rhs.at[:, MH + m * F_LANES: MH + m * F_LANES + F_DIM].set(wf[m])
    bias = jnp.zeros((1, wide), jnp.float32).at[:, :MH].set(
        jnp.transpose(b1, (1, 0, 2)).reshape(1, MH))
    j = jnp.arange(MH)[:, None]
    mm = jnp.arange(M)[None, :]
    indicator = ((j >= mm * H) & (j < (mm + 1) * H)).astype(jnp.float32)
    w2_flat = jnp.transpose(w2, (1, 0, 2)).reshape(MH, 1)
    p_pad = jnp.zeros((wide, M), jnp.float32).at[:MH, :].set(indicator * w2_flat)
    return {"rhs": rhs, "bias": bias, "p": p_pad, "mh": MH, "wide": wide, "m": M}


def ensemble_forward(params, x, image_idx, data_energy, data_forces):
    """Mirrors EnsembleModel.forward with synthetic per-member potentials."""
    N, D = x.shape
    B = int(data_energy.shape[0])
    assert B <= 8, "stats canvas layout assumes <= 8 images per batch"
    M = params["m"]
    MH = params["mh"]
    wide = params["wide"]
    R = max(16, ((N + 7) // 8) * 8)   # slab rows: >= N so f_mean fits

    # per-call data prep (tiny): pad labels, orient image indices
    df_pad = jnp.zeros((N, F_LANES), jnp.float32).at[:, :F_DIM].set(data_forces)
    idx_row = image_idx.reshape(1, N).astype(jnp.int32)
    idx_col = image_idx.reshape(N, 1).astype(jnp.int32)
    de_pad = jnp.zeros((8, 1), jnp.float32).at[:B, 0].set(
        data_energy.astype(jnp.float32))

    vmem = pltpu.MemorySpace.VMEM
    kernel = functools.partial(_ensemble_kernel, mh=MH, num_images=B)
    flops = 2 * N * D * wide + 2 * 8 * N * wide + 2 * 8 * wide * M
    bytes_accessed = 4 * (N * D + D * wide + wide + wide * M + N * F_LANES
                          + 2 * N + 8 + R * STAT_LANES)

    stats = pl.pallas_call(
        kernel,
        out_shape=jax.ShapeDtypeStruct((R, STAT_LANES), jnp.float32),
        in_specs=[pl.BlockSpec(memory_space=vmem)] * 8,
        out_specs=pl.BlockSpec(memory_space=vmem),
        scratch_shapes=[pltpu.VMEM((N, wide), jnp.float32)],
        cost_estimate=pl.CostEstimate(flops=int(flops), transcendentals=32,
                                      bytes_accessed=int(bytes_accessed)),
    )(x, params["rhs"], params["bias"], params["p"],
      idx_row, idx_col, de_pad, df_pad)

    col = lambda c: stats[0:B, c]
    return {
        "energy": col(COL_E_MEAN),                              # (B,)
        "forces": stats[0:N, FMEAN_LANE0:FMEAN_LANE0 + F_DIM],  # (N, 3)
        "uncertainty": {
            "e_max": stats[0:1, COL_E_MAX],   # torch.max(...).unsqueeze(-1)
            "e_min": stats[0:1, COL_E_MIN],
            "e_var": col(COL_E_VAR),
            "e_sd": col(COL_E_SD),
            "f_var": col(COL_F_VAR),
            "f_sd": col(COL_F_SD),
        },
        "error": {
            "e_ae": col(COL_E_AE),
            "e_se": col(COL_E_SE),
            "f_ae": col(COL_F_AE),
            "f_se": col(COL_F_SE),
            "f_maxe": stats[ROW_F_MAXE, 0:B],
            "f_mine": stats[ROW_F_MINE, 0:B],
        },
    }


if __name__ == "__main__":
    key = jax.random.PRNGKey(0)
    keys = jax.random.split(key, 8)

    # deterministic example data ("data" dict of the reference module)
    x = jax.random.normal(keys[0], (N_ATOMS, D_FEAT), jnp.float32)
    image_idx = jnp.repeat(jnp.arange(N_IMAGES, dtype=jnp.int32),
                           N_ATOMS // N_IMAGES)
    data_energy = jax.random.normal(keys[1], (N_IMAGES,), jnp.float32)
    data_forces = jax.random.normal(keys[2], (N_ATOMS, F_DIM), jnp.float32)

    # deterministic synthetic per-model parameters
    w1 = 0.1 * jax.random.normal(keys[3], (M_MODELS, D_FEAT, H_HIDDEN), jnp.float32)
    b1 = 0.1 * jax.random.normal(keys[4], (M_MODELS, 1, H_HIDDEN), jnp.float32)
    w2 = 0.1 * jax.random.normal(keys[5], (M_MODELS, 1, H_HIDDEN), jnp.float32)
    wf = 0.1 * jax.random.normal(keys[6], (M_MODELS, D_FEAT, F_DIM), jnp.float32)

    params = prepare_ensemble_params(w1, b1, w2, wf)   # hoisted: once per model
    result = ensemble_forward(params, x, image_idx, data_energy, data_forces)
    jax.tree_util.tree_map(jax.block_until_ready, result)

    # pure-JAX reference check
    def ref_member(wm1, bm1, wm2, wmf):
        h = jax.nn.relu(x @ wm1 + bm1)
        e_atom = jnp.sum(h * wm2, axis=-1)
        e = jax.ops.segment_sum(e_atom, image_idx, num_segments=N_IMAGES)
        return e, x @ wmf

    e_all, f_all = jax.vmap(ref_member)(w1, b1, w2, wf)   # (M, B), (M, N, 3)
    cnt = jax.ops.segment_sum(jnp.ones((N_ATOMS,), jnp.float32),
                              image_idx, num_segments=N_IMAGES)
    e_mean_r = e_all.mean(0)
    f_mean_r = f_all.mean(0)
    e_var_r = jnp.var(e_all, axis=0, ddof=1)
    f_var_r = jax.ops.segment_sum(jnp.var(f_all, axis=0, ddof=1).mean(axis=1),
                                  image_idx, num_segments=N_IMAGES) / cnt
    e_diff_r = e_mean_r - data_energy
    f_diff_r = f_mean_r - data_forces
    f_ae_r = jax.ops.segment_sum(jnp.abs(f_diff_r).mean(1),
                                 image_idx, num_segments=N_IMAGES) / cnt
    f_se_r = jax.ops.segment_sum(jnp.square(f_diff_r).mean(1),
                                 image_idx, num_segments=N_IMAGES) / cnt
    f_norm_r = jnp.linalg.norm(f_diff_r, axis=1)
    f_maxe_r = jax.ops.segment_max(f_norm_r, image_idx, num_segments=N_IMAGES)
    f_mine_r = jax.ops.segment_min(f_norm_r, image_idx, num_segments=N_IMAGES)

    tol = dict(rtol=2e-3, atol=2e-3)
    np.testing.assert_allclose(np.asarray(result["energy"]), np.asarray(e_mean_r), **tol)
    np.testing.assert_allclose(np.asarray(result["forces"]), np.asarray(f_mean_r), **tol)
    np.testing.assert_allclose(np.asarray(result["uncertainty"]["e_var"]),
                               np.asarray(e_var_r), **tol)
    np.testing.assert_allclose(np.asarray(result["uncertainty"]["f_var"]),
                               np.asarray(f_var_r), **tol)
    np.testing.assert_allclose(np.asarray(result["uncertainty"]["e_max"]),
                               np.asarray(e_all.max()).reshape(1), **tol)
    np.testing.assert_allclose(np.asarray(result["error"]["e_ae"]),
                               np.asarray(jnp.abs(e_diff_r)), **tol)
    np.testing.assert_allclose(np.asarray(result["error"]["f_ae"]),
                               np.asarray(f_ae_r), **tol)
    np.testing.assert_allclose(np.asarray(result["error"]["f_se"]),
                               np.asarray(f_se_r), **tol)
    np.testing.assert_allclose(np.asarray(result["error"]["f_maxe"]),
                               np.asarray(f_maxe_r), **tol)
    np.testing.assert_allclose(np.asarray(result["error"]["f_mine"]),
                               np.asarray(f_mine_r), **tol)

    print("KERNEL_OK")
</pallas_src>

<mosaic_0001>
module attributes {stable_mosaic.version = 11 : i64} {
  func.func @_ensemble_kernel(%arg0: memref<16x32xf32, #tpu.memory_space<vmem>>, %arg1: memref<32x128xf32, #tpu.memory_space<vmem>>, %arg2: memref<1x128xf32, #tpu.memory_space<vmem>>, %arg3: memref<128x3xf32, #tpu.memory_space<vmem>>, %arg4: memref<1x16xi32, #tpu.memory_space<vmem>>, %arg5: memref<16x1xi32, #tpu.memory_space<vmem>>, %arg6: memref<8x1xf32, #tpu.memory_space<vmem>>, %arg7: memref<16x8xf32, #tpu.memory_space<vmem>>, %arg8: memref<16x128xf32, #tpu.memory_space<vmem>>, %arg9: memref<16x128xf32, #tpu.memory_space<vmem>>) attributes {dimension_semantics = [], scalar_prefetch = 0 : i64, scratch_operands = 1 : i64, tpu.core_type = #tpu.core_type<tc>} {
    %c0 = arith.constant 0 : index
    %c0_0 = arith.constant 0 : index
    %0 = vector.load %arg0[%c0, %c0_0] : memref<16x32xf32, #tpu.memory_space<vmem>>, vector<16x32xf32>
    %c0_1 = arith.constant 0 : index
    %c0_2 = arith.constant 0 : index
    %1 = vector.load %arg1[%c0_1, %c0_2] : memref<32x128xf32, #tpu.memory_space<vmem>>, vector<32x128xf32>
    %cst = arith.constant dense<0.000000e+00> : vector<16x128xf32>
    %2 = tpu.matmul %0, %1, %cst {dimension_numbers = #tpu.dot_dimension_numbers<[1], [0], [0], [1], [0, 0, 1, 1], [], []>} : vector<16x32xf32>, vector<32x128xf32>, vector<16x128xf32> -> vector<16x128xf32>
    %c0_3 = arith.constant 0 : index
    %c0_4 = arith.constant 0 : index
    %3 = vector.load %arg2[%c0_3, %c0_4] : memref<1x128xf32, #tpu.memory_space<vmem>>, vector<1x128xf32>
    %4 = vector.broadcast %3 : vector<1x128xf32> to vector<16x128xf32>
    %5 = arith.addf %2, %4 : vector<16x128xf32>
    %c0_5 = arith.constant 0 : index
    %c0_6 = arith.constant 0 : index
    %6 = vector.load %arg9[%c0_5, %c0_6] : memref<16x128xf32, #tpu.memory_space<vmem>>, vector<16x128xf32>
    tpu.vector_store %arg9[%c0_5, %c0_6], %5 {strides = array<i32>} : memref<16x128xf32, #tpu.memory_space<vmem>>, vector<16x128xf32>,
    %c0_7 = arith.constant 0 : index
    %c96 = arith.constant 96 : index
    %7 = vector.load %arg9[%c0_7, %c96] : memref<16x128xf32, #tpu.memory_space<vmem>>, vector<16x8xf32>
    %c0_8 = arith.constant 0 : index
    %c104 = arith.constant 104 : index
    %8 = vector.load %arg9[%c0_8, %c104] : memref<16x128xf32, #tpu.memory_space<vmem>>, vector<16x8xf32>
    %9 = arith.addf %7, %8 : vector<16x8xf32>
    %c0_9 = arith.constant 0 : index
    %c112 = arith.constant 112 : index
    %10 = vector.load %arg9[%c0_9, %c112] : memref<16x128xf32, #tpu.memory_space<vmem>>, vector<16x8xf32>
    %11 = arith.addf %9, %10 : vector<16x8xf32>
    %cst_10 = arith.constant 0.333333343 : f32
    %12 = vector.broadcast %cst_10 : f32 to vector<16x8xf32>
    %13 = arith.mulf %11, %12 : vector<16x8xf32>
    %cst_11 = arith.constant 0.000000e+00 : f32
    %14 = vector.broadcast %cst_11 : f32 to vector<16x8xf32>
    %c0_12 = arith.constant 0 : index
    %c96_13 = arith.constant 96 : index
    %15 = vector.load %arg9[%c0_12, %c96_13] : memref<16x128xf32, #tpu.memory_space<vmem>>, vector<16x8xf32>
    %16 = arith.subf %15, %13 : vector<16x8xf32>
    %17 = arith.mulf %16, %16 : vector<16x8xf32>
    %18 = arith.addf %14, %17 : vector<16x8xf32>
    %c0_14 = arith.constant 0 : index
    %c104_15 = arith.constant 104 : index
    %19 = vector.load %arg9[%c0_14, %c104_15] : memref<16x128xf32, #tpu.memory_space<vmem>>, vector<16x8xf32>
    %20 = arith.subf %19, %13 : vector<16x8xf32>
    %21 = arith.mulf %20, %20 : vector<16x8xf32>
    %22 = arith.addf %18, %21 : vector<16x8xf32>
    %c0_16 = arith.constant 0 : index
    %c112_17 = arith.constant 112 : index
    %23 = vector.load %arg9[%c0_16, %c112_17] : memref<16x128xf32, #tpu.memory_space<vmem>>, vector<16x8xf32>
    %24 = arith.subf %23, %13 : vector<16x8xf32>
    %25 = arith.mulf %24, %24 : vector<16x8xf32>
    %26 = arith.addf %22, %25 : vector<16x8xf32>
    %cst_18 = arith.constant 5.000000e-01 : f32
    %27 = vector.broadcast %cst_18 : f32 to vector<16x8xf32>
    %28 = arith.mulf %26, %27 : vector<16x8xf32>
    %c0_19 = arith.constant 0 : index
    %c0_20 = arith.constant 0 : index
    %29 = vector.load %arg7[%c0_19, %c0_20] : memref<16x8xf32, #tpu.memory_space<vmem>>, vector<16x8xf32>
    %30 = arith.subf %13, %29 : vector<16x8xf32>
    %31 = math.absf %30 : vector<16x8xf32>
    %32 = arith.mulf %30, %30 : vector<16x8xf32>
    %cst_21 = arith.constant dense<0.000000e+00> : vector<16xf32>
    %33 = vector.multi_reduction <add>, %28, %cst_21 [1] : vector<16x8xf32> to vector<16xf32>
    %34 = vector.shape_cast %33 : vector<16xf32> to vector<16x1xf32>
    %cst_22 = arith.constant dense<0.000000e+00> : vector<16xf32>
    %35 = vector.multi_reduction <add>, %31, %cst_22 [1] : vector<16x8xf32> to vector<16xf32>
    %36 = vector.shape_cast %35 : vector<16xf32> to vector<16x1xf32>
    %cst_23 = arith.constant dense<0.000000e+00> : vector<16xf32>
    %37 = vector.multi_reduction <add>, %32, %cst_23 [1] : vector<16x8xf32> to vector<16xf32>
    %38 = vector.shape_cast %37 : vector<16xf32> to vector<16x1xf32>
    %39 = tpu.iota {dimensions = array<i32: 1>} : vector<16x128xi32>
    %c96_i32 = arith.constant 96 : i32
    %40 = vector.broadcast %c96_i32 : i32 to vector<16x128xi32>
    %41 = arith.cmpi slt, %39, %40 : vector<16x128xi32>
    %cst_24 = arith.constant 0.000000e+00 : f32
    %42 = vector.broadcast %cst_24 : f32 to vector<16x128xf32>
    %43 = arith.maximumf %5, %42 : vector<16x128xf32>
    %cst_25 = arith.constant 0.000000e+00 : f32
    %44 = vector.broadcast %cst_25 : f32 to vector<16x128xf32>
    %45 = arith.select %41, %43, %44 : vector<16x128xi1>, vector<16x128xf32>
    %c96_i32_26 = arith.constant 96 : i32
    %46 = vector.broadcast %c96_i32_26 : i32 to vector<16x128xi32>
    %47 = arith.cmpi eq, %39, %46 : vector<16x128xi32>
    %48 = vector.shape_cast %34 : vector<16x1xf32> to vector<16x1xf32>
    %49 = vector.broadcast %48 : vector<16x1xf32> to vector<16x128xf32>
    %50 = arith.select %47, %49, %45 : vector<16x128xi1>, vector<16x128xf32>
    %c97_i32 = arith.constant 97 : i32
    %51 = vector.broadcast %c97_i32 : i32 to vector<16x128xi32>
    %52 = arith.cmpi eq, %39, %51 : vector<16x128xi32>
    %53 = vector.shape_cast %36 : vector<16x1xf32> to vector<16x1xf32>
    %54 = vector.broadcast %53 : vector<16x1xf32> to vector<16x128xf32>
    %55 = arith.select %52, %54, %50 : vector<16x128xi1>, vector<16x128xf32>
    %c98_i32 = arith.constant 98 : i32
    %56 = vector.broadcast %c98_i32 : i32 to vector<16x128xi32>
    %57 = arith.cmpi eq, %39, %56 : vector<16x128xi32>
    %58 = vector.shape_cast %38 : vector<16x1xf32> to vector<16x1xf32>
    %59 = vector.broadcast %58 : vector<16x1xf32> to vector<16x128xf32>
    %60 = arith.select %57, %59, %55 : vector<16x128xi1>, vector<16x128xf32>
    %c0_27 = arith.constant 0 : index
    %c0_28 = arith.constant 0 : index
    %61 = vector.load %arg4[%c0_27, %c0_28] : memref<1x16xi32, #tpu.memory_space<vmem>>, vector<1x16xi32>
    %62 = tpu.iota {dimensions = array<i32: 0>} : vector<8x16xi32>
    %63 = vector.broadcast %61 : vector<1x16xi32> to vector<8x16xi32>
    %64 = arith.cmpi eq, %63, %62 : vector<8x16xi32>
    %65 = arith.extui %64 : vector<8x16xi1> to vector<8x16xi32>
    %66 = arith.sitofp %65 : vector<8x16xi32> to vector<8x16xf32>
    %cst_29 = arith.constant dense<0.000000e+00> : vector<8x128xf32>
    %67 = tpu.matmul %66, %60, %cst_29 {dimension_numbers = #tpu.dot_dimension_numbers<[1], [0], [0], [1], [0, 0, 1, 1], [], []>} : vector<8x16xf32>, vector<16x128xf32>, vector<8x128xf32> -> vector<8x128xf32>
    %cst_30 = arith.constant dense<0.000000e+00> : vector<8xf32>
    %68 = vector.multi_reduction <add>, %66, %cst_30 [1] : vector<8x16xf32> to vector<8xf32>
    %69 = vector.shape_cast %68 : vector<8xf32> to vector<8x1xf32>
    %cst_31 = arith.constant 1.000000e+00 : f32
    %70 = vector.broadcast %cst_31 : f32 to vector<8x1xf32>
    %71 = arith.maximumf %69, %70 : vector<8x1xf32>
    %72 = tpu.reciprocal %71 {approx = true} : vector<8x1xf32> -> vector<8x1xf32>
    %c0_32 = arith.constant 0 : index
    %c0_33 = arith.constant 0 : index
    %73 = vector.load %arg3[%c0_32, %c0_33] : memref<128x3xf32, #tpu.memory_space<vmem>>, vector<128x3xf32>
    %cst_34 = arith.constant dense<0.000000e+00> : vector<8x3xf32>
    %74 = tpu.matmul %67, %73, %cst_34 {dimension_numbers = #tpu.dot_dimension_numbers<[1], [0], [0], [1], [0, 0, 1, 1], [], []>} : vector<8x128xf32>, vector<128x3xf32>, vector<8x3xf32> -> vector<8x3xf32>
    %75 = tpu.iota {dimensions = array<i32: 1>} : vector<8x128xi32>
    %c96_i32_35 = arith.constant 96 : i32
    %76 = vector.broadcast %c96_i32_35 : i32 to vector<8x128xi32>
    %77 = arith.cmpi eq, %75, %76 : vector<8x128xi32>
    %cst_36 = arith.constant 0.000000e+00 : f32
    %78 = vector.broadcast %cst_36 : f32 to vector<8x128xf32>
    %79 = arith.select %77, %67, %78 : vector<8x128xi1>, vector<8x128xf32>
    %cst_37 = arith.constant dense<0.000000e+00> : vector<8xf32>
    %80 = vector.multi_reduction <add>, %79, %cst_37 [1] : vector<8x128xf32> to vector<8xf32>
    %81 = vector.shape_cast %80 : vector<8xf32> to vector<8x1xf32>
    %82 = arith.mulf %81, %72 : vector<8x1xf32>
    %cst_38 = arith.constant 0.333333343 : f32
    %83 = vector.broadcast %cst_38 : f32 to vector<8x1xf32>
    %84 = arith.mulf %82, %83 : vector<8x1xf32>
    %c97_i32_39 = arith.constant 97 : i32
    %85 = vector.broadcast %c97_i32_39 : i32 to vector<8x128xi32>
    %86 = arith.cmpi eq, %75, %85 : vector<8x128xi32>
    %cst_40 = arith.constant 0.000000e+00 : f32
    %87 = vector.broadcast %cst_40 : f32 to vector<8x128xf32>
    %88 = arith.select %86, %67, %87 : vector<8x128xi1>, vector<8x128xf32>
    %cst_41 = arith.constant dense<0.000000e+00> : vector<8xf32>
    %89 = vector.multi_reduction <add>, %88, %cst_41 [1] : vector<8x128xf32> to vector<8xf32>
    %90 = vector.shape_cast %89 : vector<8xf32> to vector<8x1xf32>
    %91 = arith.mulf %90, %72 : vector<8x1xf32>
    %cst_42 = arith.constant 0.333333343 : f32
    %92 = vector.broadcast %cst_42 : f32 to vector<8x1xf32>
    %93 = arith.mulf %91, %92 : vector<8x1xf32>
    %c98_i32_43 = arith.constant 98 : i32
    %94 = vector.broadcast %c98_i32_43 : i32 to vector<8x128xi32>
    %95 = arith.cmpi eq, %75, %94 : vector<8x128xi32>
    %cst_44 = arith.constant 0.000000e+00 : f32
    %96 = vector.broadcast %cst_44 : f32 to vector<8x128xf32>
    %97 = arith.select %95, %67, %96 : vector<8x128xi1>, vector<8x128xf32>
    %cst_45 = arith.constant dense<0.000000e+00> : vector<8xf32>
    %98 = vector.multi_reduction <add>, %97, %cst_45 [1] : vector<8x128xf32> to vector<8xf32>
    %99 = vector.shape_cast %98 : vector<8xf32> to vector<8x1xf32>
    %100 = arith.mulf %99, %72 : vector<8x1xf32>
    %cst_46 = arith.constant 0.333333343 : f32
    %101 = vector.broadcast %cst_46 : f32 to vector<8x1xf32>
    %102 = arith.mulf %100, %101 : vector<8x1xf32>
    %103 = math.sqrt %84 : vector<8x1xf32>
    %cst_47 = arith.constant dense<0.000000e+00> : vector<8xf32>
    %104 = vector.multi_reduction <add>, %74, %cst_47 [1] : vector<8x3xf32> to vector<8xf32>
    %105 = vector.shape_cast %104 : vector<8xf32> to vector<8x1xf32>
    %cst_48 = arith.constant 3.000000e+00 : f32
    %106 = vector.broadcast %cst_48 : f32 to vector<8x1xf32>
    %107 = arith.divf %105, %106 : vector<8x1xf32>
    %108 = vector.broadcast %107 : vector<8x1xf32> to vector<8x3xf32>
    %109 = arith.subf %74, %108 : vector<8x3xf32>
    %110 = arith.mulf %109, %109 : vector<8x3xf32>
    %cst_49 = arith.constant dense<0.000000e+00> : vector<8xf32>
    %111 = vector.multi_reduction <add>, %110, %cst_49 [1] : vector<8x3xf32> to vector<8xf32>
    %112 = vector.shape_cast %111 : vector<8xf32> to vector<8x1xf32>
    %cst_50 = arith.constant 5.000000e-01 : f32
    %113 = vector.broadcast %cst_50 : f32 to vector<8x1xf32>
    %114 = arith.mulf %112, %113 : vector<8x1xf32>
    %115 = math.sqrt %114 : vector<8x1xf32>
    %116 = tpu.iota {dimensions = array<i32: 0>} : vector<8x3xi32>
    %c2_i32 = arith.constant 2 : i32
    %117 = vector.broadcast %c2_i32 : i32 to vector<8x3xi32>
    %118 = arith.cmpi slt, %116, %117 : vector<8x3xi32>
    %cst_51 = arith.constant 0xFF800000 : f32
    %119 = vector.broadcast %cst_51 : f32 to vector<8x3xf32>
    %120 = arith.select %118, %74, %119 : vector<8x3xi1>, vector<8x3xf32>
    %121 = vector.shape_cast %120 : vector<8x3xf32> to vector<1x8x3xf32>
    %cst_52 = arith.constant dense<0xFF800000> : vector<1xf32>
    %122 = vector.multi_reduction <maximumf>, %121, %cst_52 [1, 2] : vector<1x8x3xf32> to vector<1xf32>
    %123 = vector.shape_cast %122 : vector<1xf32> to vector<1x1x1xf32>
    %124 = vector.extract %123[0, 0, 0] : f32 from vector<1x1x1xf32>
    %125 = vector.broadcast %124 : f32 to vector<1x1xf32>
    %c2_i32_53 = arith.constant 2 : i32
    %126 = vector.broadcast %c2_i32_53 : i32 to vector<8x3xi32>
    %127 = arith.cmpi slt, %116, %126 : vector<8x3xi32>
    %cst_54 = arith.constant 0x7F800000 : f32
    %128 = vector.broadcast %cst_54 : f32 to vector<8x3xf32>
    %129 = arith.select %127, %74, %128 : vector<8x3xi1>, vector<8x3xf32>
    %130 = vector.shape_cast %129 : vector<8x3xf32> to vector<1x8x3xf32>
    %cst_55 = arith.constant dense<0x7F800000> : vector<1xf32>
    %131 = vector.multi_reduction <minimumf>, %130, %cst_55 [1, 2] : vector<1x8x3xf32> to vector<1xf32>
    %132 = vector.shape_cast %131 : vector<1xf32> to vector<1x1x1xf32>
    %133 = vector.extract %132[0, 0, 0] : f32 from vector<1x1x1xf32>
    %134 = vector.broadcast %133 : f32 to vector<1x1xf32>
    %c0_56 = arith.constant 0 : index
    %c0_57 = arith.constant 0 : index
    %135 = vector.load %arg6[%c0_56, %c0_57] : memref<8x1xf32, #tpu.memory_space<vmem>>, vector<8x1xf32>
    %136 = arith.subf %107, %135 : vector<8x1xf32>
    %137 = math.absf %136 : vector<8x1xf32>
    %138 = arith.mulf %136, %136 : vector<8x1xf32>
    %c0_58 = arith.constant 0 : index
    %c0_59 = arith.constant 0 : index
    %139 = vector.load %arg5[%c0_58, %c0_59] : memref<16x1xi32, #tpu.memory_space<vmem>>, vector<16x1xi32>
    %140 = tpu.iota {dimensions = array<i32: 1>} : vector<16x2xi32>
    %141 = vector.broadcast %139 : vector<16x1xi32> to vector<16x2xi32>
    %142 = arith.cmpi eq, %141, %140 : vector<16x2xi32>
    %cst_60 = arith.constant 0xFF800000 : f32
    %143 = vector.shape_cast %38 : vector<16x1xf32> to vector<16x1xf32>
    %144 = vector.broadcast %143 : vector<16x1xf32> to vector<16x2xf32>
    %145 = vector.broadcast %cst_60 : f32 to vector<16x2xf32>
    %146 = arith.select %142, %144, %145 : vector<16x2xi1>, vector<16x2xf32>
    %cst_61 = arith.constant dense<0xFF800000> : vector<2xf32>
    %147 = vector.multi_reduction <maximumf>, %146, %cst_61 [0] : vector<16x2xf32> to vector<2xf32>
    %148 = vector.shape_cast %147 : vector<2xf32> to vector<1x2xf32>
    %149 = math.sqrt %148 : vector<1x2xf32>
    %cst_62 = arith.constant 0x7F800000 : f32
    %150 = vector.shape_cast %38 : vector<16x1xf32> to vector<16x1xf32>
    %151 = vector.broadcast %150 : vector<16x1xf32> to vector<16x2xf32>
    %152 = vector.broadcast %cst_62 : f32 to vector<16x2xf32>
    %153 = arith.select %142, %151, %152 : vector<16x2xi1>, vector<16x2xf32>
    %cst_63 = arith.constant dense<0x7F800000> : vector<2xf32>
    %154 = vector.multi_reduction <minimumf>, %153, %cst_63 [0] : vector<16x2xf32> to vector<2xf32>
    %155 = vector.shape_cast %154 : vector<2xf32> to vector<1x2xf32>
    %156 = math.sqrt %155 : vector<1x2xf32>
    %157 = tpu.iota {dimensions = array<i32: 1>} : vector<8x128xi32>
    %cst_64 = arith.constant 0.000000e+00 : f32
    %158 = vector.broadcast %cst_64 : f32 to vector<8x128xf32>
    %c0_i32 = arith.constant 0 : i32
    %159 = vector.broadcast %c0_i32 : i32 to vector<8x128xi32>
    %160 = arith.cmpi eq, %157, %159 : vector<8x128xi32>
    %161 = vector.shape_cast %107 : vector<8x1xf32> to vector<8x1xf32>
    %162 = vector.broadcast %161 : vector<8x1xf32> to vector<8x128xf32>
    %163 = arith.select %160, %162, %158 : vector<8x128xi1>, vector<8x128xf32>
    %c1_i32 = arith.constant 1 : i32
    %164 = vector.broadcast %c1_i32 : i32 to vector<8x128xi32>
    %165 = arith.cmpi eq, %157, %164 : vector<8x128xi32>
    %166 = vector.shape_cast %114 : vector<8x1xf32> to vector<8x1xf32>
    %167 = vector.broadcast %166 : vector<8x1xf32> to vector<8x128xf32>
    %168 = arith.select %165, %167, %163 : vector<8x128xi1>, vector<8x128xf32>
    %c2_i32_65 = arith.constant 2 : i32
    %169 = vector.broadcast %c2_i32_65 : i32 to vector<8x128xi32>
    %170 = arith.cmpi eq, %157, %169 : vector<8x128xi32>
    %171 = vector.shape_cast %115 : vector<8x1xf32> to vector<8x1xf32>
    %172 = vector.broadcast %171 : vector<8x1xf32> to vector<8x128xf32>
    %173 = arith.select %170, %172, %168 : vector<8x128xi1>, vector<8x128xf32>
    %c3_i32 = arith.constant 3 : i32
    %174 = vector.broadcast %c3_i32 : i32 to vector<8x128xi32>
    %175 = arith.cmpi eq, %157, %174 : vector<8x128xi32>
    %176 = vector.shape_cast %84 : vector<8x1xf32> to vector<8x1xf32>
    %177 = vector.broadcast %176 : vector<8x1xf32> to vector<8x128xf32>
    %178 = arith.select %175, %177, %173 : vector<8x128xi1>, vector<8x128xf32>
    %c4_i32 = arith.constant 4 : i32
    %179 = vector.broadcast %c4_i32 : i32 to vector<8x128xi32>
    %180 = arith.cmpi eq, %157, %179 : vector<8x128xi32>
    %181 = vector.shape_cast %103 : vector<8x1xf32> to vector<8x1xf32>
    %182 = vector.broadcast %181 : vector<8x1xf32> to vector<8x128xf32>
    %183 = arith.select %180, %182, %178 : vector<8x128xi1>, vector<8x128xf32>
    %c5_i32 = arith.constant 5 : i32
    %184 = vector.broadcast %c5_i32 : i32 to vector<8x128xi32>
    %185 = arith.cmpi eq, %157, %184 : vector<8x128xi32>
    %186 = vector.shape_cast %137 : vector<8x1xf32> to vector<8x1xf32>
    %187 = vector.broadcast %186 : vector<8x1xf32> to vector<8x128xf32>
    %188 = arith.select %185, %187, %183 : vector<8x128xi1>, vector<8x128xf32>
    %c6_i32 = arith.constant 6 : i32
    %189 = vector.broadcast %c6_i32 : i32 to vector<8x128xi32>
    %190 = arith.cmpi eq, %157, %189 : vector<8x128xi32>
    %191 = vector.shape_cast %138 : vector<8x1xf32> to vector<8x1xf32>
    %192 = vector.broadcast %191 : vector<8x1xf32> to vector<8x128xf32>
    %193 = arith.select %190, %192, %188 : vector<8x128xi1>, vector<8x128xf32>
    %c7_i32 = arith.constant 7 : i32
    %194 = vector.broadcast %c7_i32 : i32 to vector<8x128xi32>
    %195 = arith.cmpi eq, %157, %194 : vector<8x128xi32>
    %196 = vector.shape_cast %93 : vector<8x1xf32> to vector<8x1xf32>
    %197 = vector.broadcast %196 : vector<8x1xf32> to vector<8x128xf32>
    %198 = arith.select %195, %197, %193 : vector<8x128xi1>, vector<8x128xf32>
    %c8_i32 = arith.constant 8 : i32
    %199 = vector.broadcast %c8_i32 : i32 to vector<8x128xi32>
    %200 = arith.cmpi eq, %157, %199 : vector<8x128xi32>
    %201 = vector.shape_cast %102 : vector<8x1xf32> to vector<8x1xf32>
    %202 = vector.broadcast %201 : vector<8x1xf32> to vector<8x128xf32>
    %203 = arith.select %200, %202, %198 : vector<8x128xi1>, vector<8x128xf32>
    %c9_i32 = arith.constant 9 : i32
    %204 = vector.broadcast %c9_i32 : i32 to vector<8x128xi32>
    %205 = arith.cmpi eq, %157, %204 : vector<8x128xi32>
    %206 = vector.shape_cast %125 : vector<1x1xf32> to vector<1x1xf32>
    %207 = vector.broadcast %206 : vector<1x1xf32> to vector<8x128xf32>
    %208 = arith.select %205, %207, %203 : vector<8x128xi1>, vector<8x128xf32>
    %c10_i32 = arith.constant 10 : i32
    %209 = vector.broadcast %c10_i32 : i32 to vector<8x128xi32>
    %210 = arith.cmpi eq, %157, %209 : vector<8x128xi32>
    %211 = vector.shape_cast %134 : vector<1x1xf32> to vector<1x1xf32>
    %212 = vector.broadcast %211 : vector<1x1xf32> to vector<8x128xf32>
    %213 = arith.select %210, %212, %208 : vector<8x128xi1>, vector<8x128xf32>
    %c0_66 = arith.constant 0 : index
    %c0_67 = arith.constant 0 : index
    %214 = vector.load %arg8[%c0_66, %c0_67] : memref<16x128xf32, #tpu.memory_space<vmem>>, vector<8x128xf32>
    tpu.vector_store %arg8[%c0_66, %c0_67], %213 {strides = array<i32>} : memref<16x128xf32, #tpu.memory_space<vmem>>, vector<8x128xf32>,
    %cst_68 = arith.constant 0.000000e+00 : f32
    %215 = vector.broadcast %cst_68 : f32 to vector<8x128xf32>
    %c8 = arith.constant 8 : index
    %c0_69 = arith.constant 0 : index
    %216 = vector.load %arg8[%c8, %c0_69] : memref<16x128xf32, #tpu.memory_space<vmem>>, vector<8x128xf32>
    tpu.vector_store %arg8[%c8, %c0_69], %215 {strides = array<i32>} : memref<16x128xf32, #tpu.memory_space<vmem>>, vector<8x128xf32>,
    %c8_70 = arith.constant 8 : index
    %c0_71 = arith.constant 0 : index
    %217 = vector.load %arg8[%c8_70, %c0_71] : memref<16x128xf32, #tpu.memory_space<vmem>>, vector<1x2xf32>
    tpu.vector_store %arg8[%c8_70, %c0_71], %149 {strides = array<i32>} : memref<16x128xf32, #tpu.memory_space<vmem>>, vector<1x2xf32>,
    %c9 = arith.constant 9 : index
    %c0_72 = arith.constant 0 : index
    %218 = vector.load %arg8[%c9, %c0_72] : memref<16x128xf32, #tpu.memory_space<vmem>>, vector<1x2xf32>
    tpu.vector_store %arg8[%c9, %c0_72], %156 {strides = array<i32>} : memref<16x128xf32, #tpu.memory_space<vmem>>, vector<1x2xf32>,
    %c0_73 = arith.constant 0 : index
    %c16 = arith.constant 16 : index
    %219 = vector.load %arg8[%c0_73, %c16] : memref<16x128xf32, #tpu.memory_space<vmem>>, vector<16x8xf32>
    tpu.vector_store %arg8[%c0_73, %c16], %13 {strides = array<i32>} : memref<16x128xf32, #tpu.memory_space<vmem>>, vector<16x8xf32>,
    return
  }
}

</mosaic_0001>

<bundles_post_ra>
// kernel: tpu_custom_call.1
= control target key start
LH: loop header
LB: loop body
LE: loop exit
PB: predicated region body
PF: predicated region fallthrough
CT: control target
= control target key end

     0   :  { %s833_s0 = inlined_call_operand.vmem [shape: f32[16,32], index: 0, kind: input, shape index: {}]   ;;  %s834_s1 = inlined_call_operand.vmem [shape: f32[32,128], index: 1, kind: input, shape index: {}]   ;;  %s835_s2 = inlined_call_operand.vmem [shape: f32[1,128], index: 2, kind: input, shape index: {}]   ;;  %s836_s3 = inlined_call_operand.vmem [shape: f32[128,3], index: 3, kind: input, shape index: {}]   ;;  %s837_s4 = inlined_call_operand.vmem [shape: s32[1,16], index: 4, kind: input, shape index: {}]   ;;  %s838_s5 = inlined_call_operand.vmem [shape: s32[16,1], index: 5, kind: input, shape index: {}]   ;;  %s839_s6 = inlined_call_operand.vmem [shape: f32[8,1], index: 6, kind: input, shape index: {}]   ;;  %s840_s7 = inlined_call_operand.vmem [shape: f32[16,8], index: 7, kind: input, shape index: {}]   ;;  %s841_s8 = inlined_call_operand.hbm [shape: f32[16,128], index: 8, kind: output, shape index: {}]  }
   0x1   :  { %v35_v0 = vld [vmem:[%s834_s1 + $0x18] sm:$0xff]  ;;  %v34_v1 = vld [vmem:[%s834_s1 + $0x10] sm:$0xff]  ;;  %v33_v2 = vld [vmem:[%s834_s1 + $0x8] sm:$0xff] }
   0x2   :  { %59 = vmatpush.msra.mxu0 %v35_v0 }
   0x4   :  { %60 = vmatpush.msra.mxu0 %v34_v1 }
   0x5   :  { %13 = vsyncpa [#allocation4], 0  ;;  %v32_v3 = vld [vmem:[%s834_s1] sm:$0xff]  ;;  %vm40_vm0 = vcmask 261120   ;;  %v31_v5 = vld [vmem:[%s833_s0 + $0x8] sm:$0xff]  ;;  %s561_s1 = smov 112  }
   0x6   :  { %61 = vmatpush.msra.mxu0 %v33_v2  ;;  %v30_v4 = vld [vmem:[%s833_s0] sm:$0xff]  ;;  %s562_s19 = smov 120   ;;  %s563_s0 = smov 8   ;;  %v145_v26 = vld [vmem:[%s840_s7 + $0x8] sm:$0xff]  ;;  %vm168_vm1 = vcmask 64512   ;;  %vm226_vm3 = vcmask 130048  }
   0x7   :  { %v521_v7 = vld [vmem:[%s835_s2] ss:$0 sm:$0xff]  ;;  %s564_s2 = smov 16   ;;  %s565_s22 = smov 96   ;;  %vm318_vm8 = vcmask 23552   ;;  %vm387_vm12 = vcmask 15360  }
   0x8   :  { %62 = vmatpush.msra.mxu0 %v32_v3  ;;  %v144_v33 = vld [vmem:[%s840_s7] sm:$0xff]  ;;  %s566_s25 = smov 32   ;;  %s569_s13 = smov 48   ;;  %vm468_vm14 = vcmask 8192  }
   0x9   :  { %498 = vmatmul.msk.f32.vlgmr.msra.gmra.mxu0 %vm40_vm0, %v30_v4  ;;  %s571_s16 = smov [#allocation3]  }
   0xa   :  { %s484_s17 = sshll.u32 %s571_s16, 4  ;;  %s485_s17 = int_to_ptr.vmem [resolvable:$true] %s484_s17 }
  0x11   :  { %499 = vmatmul.msk.f32.gmra.mxu0 %vm40_vm0, %v31_v5  ;;  %v203_v5 = vlaneseq }
  0x86   :  { %v64_v6 = vpop.f32.mrf.mxu0 }
  0x87   :  { %v645_v10 = vadd.f32 %v521_v7, %v64_v6 }
  0x8e   :  { %v67_v8 = vpop.f32.mrf.mxu0 }
  0x8f   :  { %v639_v9 = vadd.f32 %v521_v7, %v67_v8  ;;  %v691_v7 = vshrl.u32 %v203_v5, 7  ;;  %v522_v8 = vld [vmem:[%s837_s4] ss:$0 sm:$0xff] }
  0x91   :  { %86 = vrot.lane.b32.xlu1 %v639_v9, %s561_s1  ;;  %78 = vrot.lane.b32.xlu0 %v639_v9, %s562_s19  ;;  %vm223_vm2 = vcmp.eq.s32.totalorder %v522_v8, %v691_v7  ;;  %vm348_vm9 = vcmp.lt.s32.totalorder %v691_v7, 2 }
  0x99   :  { %84 = vrot.lane.b32.xlu1 %v645_v10, %s561_s1  ;;  %76 = vrot.lane.b32.xlu0 %v645_v10, %s562_s19 }
 0x103   :  { %v87_v11 = vpop.permute.xlu1 %86  ;;  %v79_v12 = vpop.permute.xlu0 %78 }
 0x104   :  { %v83_v13 = vadd.f32 %v79_v12, %v639_v9  ;;  %v567_v12 = vmov 0.0  }
 0x105   :  { %467 = vst [vmem:[#allocation3 + $0x8] sm:$0xff] %v567_v12 }
 0x106   :  { %v91_v14 = vadd.f32 %v87_v11, %v83_v13  ;;  %v697_v11 = vand.u32 127, %v203_v5  ;;  %v500_v13 = vsel %vm223_vm2, 1.0, %v567_v12  ;;  %vm477_vm2 = vcmask 195712  }
 0x108   :  { %v652_v15 = vmul.f32 0.33333334, %v91_v14  ;;  %v207_v14 = vmax.f32 %v639_v9, 0.0  ;;  %vm210_vm4 = vcmp.eq.s32.totalorder %v697_v11, 96  ;;  %vm205_vm5 = vcmp.lt.s32.totalorder %v697_v11, 96 }
 0x109   :  { %vm213_vm6 = vcmp.eq.s32.totalorder %v697_v11, 97  ;;  %vm216_vm7 = vcmp.eq.s32.totalorder %v697_v11, 98 }
 0x10a   :  { %104 = vrot.lane.b32.xlu2 %v652_v15, %s563_s0  ;;  %124 = vrot.lane.b32.xlu0 %v652_v15, %s564_s2  ;;  %v95_v39 = vsub.f32 %v639_v9, %v652_v15 }
 0x10b   :  { %v77_v16 = vpop.permute.xlu0 %76  ;;  %v85_v18 = vpop.permute.xlu1 %84 }
 0x10c   :  { %v82_v17 = vadd.f32 %v77_v16, %v645_v10  ;;  %v97_v40 = vmul.f32 %v95_v39, %v95_v39  ;;  %v270_v16 = vld [vmem:[%s836_s3 + $0x78] sm:$0xff] }
 0x10d   :  { %271 = vmatpush.msra.mxu2 %v270_v16 }
 0x10e   :  { %v90_v19 = vadd.f32 %v85_v18, %v82_v17  ;;  %v269_v17 = vld [vmem:[%s836_s3 + $0x70] sm:$0xff]  ;;  %v250_v18 = vsel %vm226_vm3, %v500_v13, 0.0 }
 0x10f   :  { %272 = vmatpush.msra.mxu2 %v269_v17 }
 0x110   :  { %v658_v20 = vmul.f32 0.33333334, %v90_v19  ;;  %v268_v19 = vld [vmem:[%s836_s3 + $0x68] sm:$0xff] }
 0x111   :  { %273 = vmatpush.msra.mxu2 %v268_v19 }
 0x112   :  { %122 = vrot.lane.b32.xlu1 %v658_v20, %s564_s2  ;;  %102 = vrot.lane.b32.xlu2 %v658_v20, %s563_s0  ;;  %v94_v44 = vsub.f32 %v645_v10, %v658_v20  ;;  %s572_s2 = smov 128  }
 0x114   :  { %v96_v47 = vmul.f32 %v94_v44, %v94_v44 }
 0x164   :  { %v105_v21 = vpop.permute.xlu2 %104 }
 0x165   :  { %v109_v22 = vsub.f32 %v639_v9, %v105_v21 }
 0x167   :  { %v111_v23 = vmul.f32 %v109_v22, %v109_v22  ;;  %v267_v22 = vld [vmem:[%s836_s3 + $0x60] sm:$0xff] }
 0x168   :  { %274 = vmatpush.msra.mxu2 %v267_v22 }
 0x169   :  { %116 = vrot.lane.b32.xlu2 %v111_v23, %s562_s19 }
 0x16c   :  { %v103_v24 = vpop.permute.xlu2 %102 }
 0x16d   :  { %v108_v25 = vsub.f32 %v645_v10, %v103_v24 }
 0x16f   :  { %v110_v27 = vmul.f32 %v108_v25, %v108_v25 }
 0x171   :  { %150 = vrot.lane.b32.xlu2 %v145_v26, %s565_s22  ;;  %114 = vrot.lane.b32.xlu0 %v110_v27, %s562_s19  ;;  %v266_v26 = vld [vmem:[%s836_s3 + $0x58] sm:$0xff]  ;;  %s486_s19 = sshll.u32 %s841_s8, 4  ;;  %s487_s19 = int_to_ptr.hbm [resolvable:$true] %s486_s19 }
 0x172   :  { %275 = vmatpush.msra.mxu2 %v266_v26 }
 0x17c   :  { %v125_v28 = vpop.permute.xlu0 %124 }
 0x17d   :  { %v129_v29 = vsub.f32 %v639_v9, %v125_v28  ;;  %v209_v9 = vsel %vm205_vm5, %v207_v14, 0.0  ;;  %v265_v28 = vld [vmem:[%s836_s3 + $0x50] sm:$0xff] }
 0x17e   :  { %276 = vmatpush.msra.mxu2 %v265_v28 }
 0x17f   :  { %v131_v30 = vmul.f32 %v129_v29, %v129_v29  ;;  %v264_v29 = vld [vmem:[%s836_s3 + $0x48] sm:$0xff] }
 0x180   :  { %277 = vmatpush.msra.mxu2 %v264_v29 }
 0x181   :  { %136 = vrot.lane.b32.xlu1 %v131_v30, %s561_s1  ;;  %v263_v30 = vld [vmem:[%s836_s3 + $0x40] sm:$0xff] }
 0x182   :  { %278 = vmatpush.msra.mxu2 %v263_v30 }
 0x184   :  { %v123_v31 = vpop.permute.xlu1 %122 }
 0x185   :  { %v128_v32 = vsub.f32 %v645_v10, %v123_v31  ;;  %v262_v31 = vld [vmem:[%s836_s3 + $0x38] sm:$0xff] }
 0x186   :  { %279 = vmatpush.msra.mxu2 %v262_v31 }
 0x187   :  { %v130_v34 = vmul.f32 %v128_v32, %v128_v32  ;;  %v261_v32 = vld [vmem:[%s836_s3 + $0x30] sm:$0xff] }
 0x188   :  { %280 = vmatpush.msra.mxu2 %v261_v32 }
 0x189   :  { %134 = vrot.lane.b32.xlu0 %v130_v34, %s561_s1  ;;  %148 = vrot.lane.b32.xlu1 %v144_v33, %s565_s22  ;;  %v260_v33 = vld [vmem:[%s836_s3 + $0x28] sm:$0xff]  ;;  %v259_v34 = vld [vmem:[%s836_s3 + $0x20] sm:$0xff] }
 0x18a   :  { %281 = vmatpush.msra.mxu2 %v260_v33 }
 0x18c   :  { %282 = vmatpush.msra.mxu2 %v259_v34 }
 0x1c3   :  { %v117_v35 = vpop.permute.xlu2 %116 }
 0x1c4   :  { %v121_v41 = vadd.f32 %v117_v35, %v97_v40  ;;  %v206_v35 = vmax.f32 %v645_v10, 0.0  ;;  %v256_v10 = vld [vmem:[%s836_s3 + $0x8] sm:$0xff] }
 0x1c6   :  { %v208_v39 = vsel %vm205_vm5, %v206_v35, 0.0 }
 0x1cb   :  { %v151_v36 = vpop.permute.xlu2 %150 }
 0x1cc   :  { %v155_v37 = vsub.f32 %v652_v15, %v151_v36  ;;  %v258_v36 = vld [vmem:[%s836_s3 + $0x18] sm:$0xff] }
 0x1cd   :  { %283 = vmatpush.msra.mxu2 %v258_v36 }
 0x1ce   :  { %v157_v38 = vand.u32 2147483647, %v155_v37  ;;  %v159_v53 = vmul.f32 %v155_v37, %v155_v37 }
 0x1d0   :  { %179 = vrot.lane.b32.xlu0 %v157_v38, %s566_s25  ;;  %v257_v38 = vld [vmem:[%s836_s3 + $0x10] sm:$0xff] }
 0x1d1   :  { %284 = vmatpush.msra.mxu2 %v257_v38 }
 0x1d3   :  { %285 = vmatpush.msra.mxu2 %v256_v10 }
 0x1e3   :  { %v115_v42 = vpop.permute.xlu0 %114 }
 0x1e4   :  { %v120_v48 = vadd.f32 %v115_v42, %v96_v47 }
 0x1f3   :  { %v137_v43 = vpop.permute.xlu1 %136 }
 0x1f4   :  { %v141_v45 = vadd.f32 %v137_v43, %v121_v41 }
 0x1f6   :  { %v143_v46 = vmul.f32 0.5, %v141_v45  ;;  %v255_v45 = vld [vmem:[%s836_s3] sm:$0xff] }
 0x1f7   :  { %286 = vmatpush.msra.mxu2 %v255_v45 }
 0x1f8   :  { %164 = vrot.lane.b32.xlu2 %v143_v46, %s566_s25 }
 0x1fb   :  { %v149_v49 = vpop.permute.xlu1 %148  ;;  %v135_v50 = vpop.permute.xlu0 %134 }
 0x1fc   :  { %v154_v51 = vsub.f32 %v658_v20, %v149_v49  ;;  %v140_v52 = vadd.f32 %v135_v50, %v120_v48  ;;  %v568_v48 = vmov 0  }
 0x1fd   :  { %518 = vset.pattern.permute.xlu0 %v568_v48  ;;  %519 = vset.pattern.permute.xlu1 %v568_v48 }
 0x1fe   :  { %v156_v54 = vand.u32 2147483647, %v154_v51  ;;  %v142_v55 = vmul.f32 0.5, %v140_v52  ;;  %v158_v56 = vmul.f32 %v154_v51, %v154_v51  ;;  %520 = vset.pattern.permute.xlu2 %v568_v48 }
 0x200   :  { %193 = vrot.lane.b32.xlu2 %v159_v53, %s566_s25  ;;  %177 = vrot.lane.b32.xlu0 %v156_v54, %s566_s25 }
 0x201   :  { %162 = vrot.lane.b32.xlu1 %v142_v55, %s566_s25 }
 0x209   :  { %191 = vrot.lane.b32.xlu1 %v158_v56, %s566_s25 }
 0x242   :  { %v180_v57 = vpop.permute.xlu0 %179 }
 0x243   :  { %v186_v58 = vsel %vm168_vm1, %v180_v57, 0.0  ;;  %v375_v57 = vld [vmem:[%s838_s5] sm:$0xff] }
 0x244   :  { %187 = vadd.xlane.f32.xlu0 %v186_v58  ;;  %v376_v58 = vld [vmem:[%s838_s5 + $0x8] sm:$0xff] }
 0x252   :  { %v165_v59 = vpop.permute.xlu2 %164 }
 0x253   :  { %v172_v62 = vsel %vm168_vm1, %v165_v59, 0.0  ;;  %v570_v59 = vmov 3.0  }
 0x254   :  { %523 = vrcp.f32 %v570_v59 }
 0x25a   :  { %v194_v60 = vpop.permute.xlu2 %193 }
 0x25b   :  { %v200_v61 = vsel %vm168_vm1, %v194_v60, 0.0  ;;  %v524_v60 = vpop.eup %523 }
 0x25c   :  { %201 = vadd.xlane.f32.xlu2 %v200_v61  ;;  %v323_v61 = vmul.f32 3.0, %v524_v60  ;;  %vm327_vm10 = vweird.f32 %v524_v60 }
 0x264   :  { %173 = vadd.xlane.f32.xlu2 %v172_v62  ;;  %v324_v62 = vsub.f32 1.0, %v323_v61 }
 0x272   :  { %v178_v63 = vpop.permute.xlu0 %177 }
 0x273   :  { %v163_v0 = vpop.permute.xlu1 %162  ;;  %v183_v1 = vsel %vm168_vm1, %v178_v63, 0.0  ;;  %v325_v63 = vmul.f32 %v524_v60, %v324_v62 }
 0x274   :  { %v169_v2 = vsel %vm168_vm1, %v163_v0, 0.0  ;;  %184 = vadd.xlane.f32.xlu2 %v183_v1 }
 0x275   :  { %170 = vadd.xlane.f32.xlu1 %v169_v2  ;;  %v326_v2 = vadd.f32 %v524_v60, %v325_v63 }
 0x27b   :  { %v192_v3 = vpop.permute.xlu1 %191 }
 0x27c   :  { %v197_v4 = vsel %vm168_vm1, %v192_v3, 0.0  ;;  %v328_v3 = vsel %vm327_vm10, %v524_v60, %v326_v2  ;;  %vm438_vm10 = vcmp.eq.s32.totalorder %v697_v11, 3 }
 0x27d   :  { %198 = vadd.xlane.f32.xlu0 %v197_v4  ;;  %251 = vadd.xlane.f32.xlu1 %v250_v18  ;;  %v371_v4 = vld [vmem:[%s839_s6] sm:$0xff] }
 0x2b7   :  { %v188_v23 = vpop.xlane.xlu0 %187 }
 0x2cf   :  { %v689_v6 = vpop.xlane.xlu2 %201 }
 0x2d7   :  { %v174_v21 = vpop.xlane.xlu2 %173 }
 0x2d8   :  { %v212_v24 = vsel %vm210_vm4, %v174_v21, %v209_v9 }
 0x2d9   :  { %v215_v25 = vsel %vm213_vm6, %v188_v23, %v212_v24 }
 0x2da   :  { %v218_v27 = vsel %vm216_vm7, %v689_v6, %v215_v25 }
 0x2db   :  { %244 = vmatpush.msra.mxu1 %v218_v27 }
 0x2e7   :  { %v185_v41 = vpop.xlane.xlu2 %184 }
 0x2e8   :  { %v171_v37 = vpop.xlane.xlu1 %170 }
 0x2e9   :  { %v211_v40 = vsel %vm210_vm4, %v171_v37, %v208_v39 }
 0x2ea   :  { %v214_v42 = vsel %vm213_vm6, %v185_v41, %v211_v40 }
 0x2f0   :  { %v766_v43 = vpop.xlane.xlu0 %198  ;;  %v793_v0 = vpop.xlane.xlu1 %251 }
 0x2f1   :  { %v217_v44 = vsel %vm216_vm7, %v766_v43, %v214_v42 }
 0x2f2   :  { %245 = vmatpush.msra.mxu1 %v217_v44 }
 0x2f3   :  { %501 = vmatmul.msk.f32.vlgmr.msra.gmra.mxu1 %vm226_vm3, %v500_v13 }
 0x370   :  { %v247_v46 = vpop.f32.mrf.mxu1 }
 0x371   :  { %287 = vmatmul.f32.vlgmr.msra.gmra.mxu2 %v247_v46  ;;  %v291_v47 = vsel %vm210_vm4, %v247_v46, 0.0  ;;  %v296_v55 = vsel %vm213_vm6, %v247_v46, 0.0  ;;  %v301_v56 = vsel %vm216_vm7, %v247_v46, 0.0  ;;  %vm432_vm4 = vcmp.eq.s32.totalorder %v697_v11, 0 }
 0x372   :  { %292 = vadd.xlane.f32.xlu2 %v291_v47  ;;  %vm434_vm6 = vcmp.eq.s32.totalorder %v697_v11, 1 }
 0x3e5   :  { %v795_v1 = vpop.xlane.xlu2 %292 }
 0x3f4   :  { %v288_v49 = vpop.f32.mrf.mxu2 }
 0x3f5   :  { %v319_v50 = vsel %vm318_vm8, %v288_v49, 0.0  ;;  %v360_v51 = vsel %vm348_vm9, %v288_v49, inf  ;;  %v349_v52 = vsel %vm348_vm9, %v288_v49, -inf }
 0x3f6   :  { %320 = vadd.xlane.f32.xlu1 %v319_v50  ;;  %v361_v53 = vsel %vm318_vm8, %v360_v51, inf  ;;  %v350_v54 = vsel %vm318_vm8, %v349_v52, -inf }
 0x3f7   :  { %362 = vmin.xlane.f32.xlu0 %v361_v53  ;;  %351 = vmax.xlane.f32.xlu2 %v350_v54 }
 0x3ff   :  { %297 = vadd.xlane.f32.xlu2 %v296_v55 }
 0x407   :  { %302 = vadd.xlane.f32.xlu2 %v301_v56 }
 0x40b   :  { %378 = vperm.xlu0 %518, %v375_v57  }
 0x40f   :  { %381 = vperm.xlu1 %519, %v376_v58  }
 0x413   :  { %473 = vrot.lane.b32.xlu0 %v652_v15, %s569_s13 }
 0x469   :  { %v321_v5 = vpop.xlane.xlu1 %320 }
 0x46a   :  { %v800_v7 = vmul.f32 %v328_v3, %v321_v5  ;;  %v363_v15 = vpop.xlane.xlu0 %362  ;;  %v352_v8 = vpop.xlane.xlu2 %351 }
 0x46b   :  { %v364_v12 = vrot.slane %v363_v15, 4  ;;  %v353_v13 = vrot.slane %v352_v8, 4 }
 0x46c   :  { %v372_v14 = vsub.f32 %v800_v7, %v371_v4  ;;  %v330_v16 = vsub.f32 %v288_v49, %v800_v7 }
 0x46d   :  { %v365_v17 = vmin.f32 %v363_v15, %v364_v12  ;;  %v354_v18 = vmax.f32 %v352_v8, %v353_v13 }
 0x46e   :  { %v373_v19 = vand.u32 2147483647, %v372_v14  ;;  %v331_v9 = vmul.f32 %v330_v16, %v330_v16  ;;  %v374_v42 = vmul.f32 %v372_v14, %v372_v14  ;;  %v253_v16 = vmax.f32 %v793_v0, 1.0 }
 0x46f   :  { %v366_v21 = vrot.slane %v365_v17, 2  ;;  %v355_v22 = vrot.slane %v354_v18, 2 }
 0x470   :  { %445 = vperm.xlu1 %519, %v373_v19   ;;  %v332_v23 = vsel %vm318_vm8, %v331_v9, 0.0  ;;  %vm436_vm8 = vcmp.eq.s32.totalorder %v697_v11, 2 }
 0x471   :  { %333 = vadd.xlane.f32.xlu2 %v332_v23  ;;  %v356_v24 = vmax.f32 %v354_v18, %v355_v22  ;;  %v367_v25 = vmin.f32 %v365_v17, %v366_v21 }
 0x472   :  { %v298_v19 = vpop.xlane.xlu2 %297 }
 0x473   :  { %v357_v26 = vrot.slane %v356_v24, 1  ;;  %v368_v27 = vrot.slane %v367_v25, 1 }
 0x475   :  { %v358_v28 = vmax.f32 %v356_v24, %v357_v26  ;;  %v369_v29 = vmin.f32 %v367_v25, %v368_v27 }
 0x477   :  { %502 = vpush %v358_v28 }
 0x478   :  { %504 = vpush %v369_v29  ;;  %471 = vrot.lane.b32.xlu1 %v658_v20, %s569_s13 }
 0x47a   :  { %v303_v21 = vpop.xlane.xlu2 %302 }
 0x47d   :  { %v379_v30 = vpop.permute.xlu0 %378 }
 0x47e   :  { %vm383_vm11 = vcmp.eq.s32.totalorder %v379_v30, %v697_v11 }
 0x47f   :  { %v385_v31 = vsel %vm383_vm11, %v766_v43, -inf  ;;  %v409_v32 = vsel %vm383_vm11, %v766_v43, inf  ;;  %vm440_vm11 = vcmp.eq.s32.totalorder %v697_v11, 4 }
 0x480   :  { %v388_v36 = vsel %vm387_vm12, %v385_v31, -inf  ;;  %v411_v37 = vsel %vm387_vm12, %v409_v32, inf }
 0x481   :  { %v382_v33 = vpop.permute.xlu1 %381 }
 0x482   :  { %vm384_vm13 = vcmp.eq.s32.totalorder %v382_v33, %v697_v11 }
 0x483   :  { %v386_v34 = vsel %vm384_vm13, %v689_v6, -inf  ;;  %v410_v35 = vsel %vm384_vm13, %v689_v6, inf  ;;  %vm442_vm13 = vcmp.eq.s32.totalorder %v697_v11, 5 }
 0x484   :  { %v389_v38 = vsel %vm387_vm12, %v386_v34, -inf  ;;  %v412_v39 = vsel %vm387_vm12, %v410_v35, inf }
 0x485   :  { %v390_v20 = vmax.f32 %v388_v36, %v389_v38  ;;  %v413_v40 = vmin.f32 %v411_v37, %v412_v39  ;;  %v474_v14 = vpop.permute.xlu0 %473  ;;  %v433_v39 = vsel %vm432_vm4, %v800_v7, 0.0 }
 0x487   :  { %v391_v41 = vrot.slane %v390_v20, 4  ;;  %v414_v10 = vrot.slane %v413_v40, 4 }
 0x489   :  { %v392_v44 = vmax.f32 %v390_v20, %v391_v41  ;;  %v415_v45 = vmin.f32 %v413_v40, %v414_v10  ;;  %452 = vperm.xlu2 %520, %v374_v42  }
 0x48b   :  { %v393_v43 = vrot.slane %v392_v44, 2  ;;  %v416_v46 = vrot.slane %v415_v45, 2 }
 0x48d   :  { %v394_v47 = vmax.f32 %v392_v44, %v393_v43  ;;  %v417_v48 = vmin.f32 %v415_v45, %v416_v46 }
 0x48f   :  { %v395_v49 = vrot.slane %v394_v47, 1  ;;  %v418_v50 = vrot.slane %v417_v48, 1 }
 0x491   :  { %v396_v51 = vmax.f32 %v394_v47, %v395_v49  ;;  %v419_v6 = vmin.f32 %v417_v48, %v418_v50 }
 0x493   :  { %525 = vrsqrt.f32 %v396_v51  ;;  %vm404_vm15 = vcmp.eq.f32.partialorder %v396_v51, inf  ;;  %v407_v3 = vand.u32 2147483648, %v396_v51  ;;  %vm406_vm0 = vcmp.eq.f32.partialorder %v396_v51, 0.0 }
 0x494   :  { %527 = vrsqrt.f32 %v419_v6  ;;  %vm427_vm1 = vcmp.eq.f32.partialorder %v419_v6, inf  ;;  %v430_v15 = vand.u32 2147483648, %v419_v6  ;;  %vm429_vm3 = vcmp.eq.f32.partialorder %v419_v6, 0.0 }
 0x495   :  { %529 = vrcp.f32 %v253_v16 }
 0x499   :  { %v526_v52 = vpop.eup %525 }
 0x49a   :  { %v528_v53 = vpop.eup %527  ;;  %v398_v54 = vmul.f32 %v526_v52, %v396_v51 }
 0x49b   :  { %v421_v55 = vmul.f32 %v528_v53, %v419_v6  ;;  %v530_v17 = vpop.eup %529 }
 0x49c   :  { %v399_v56 = vmul.f32 %v526_v52, %v398_v54  ;;  %v294_v18 = vmul.f32 %v530_v17, %v795_v1  ;;  %v299_v40 = vmul.f32 %v530_v17, %v298_v19  ;;  %v304_v44 = vmul.f32 %v530_v17, %v303_v21 }
 0x49d   :  { %v422_v57 = vmul.f32 %v528_v53, %v421_v55 }
 0x49e   :  { %v400_v58 = vmul.f32 0.5, %v399_v56  ;;  %v295_v9 = vmul.f32 0.33333334, %v294_v18  ;;  %v300_v47 = vmul.f32 0.33333334, %v299_v40 }
 0x49f   :  { %v423_v59 = vmul.f32 0.5, %v422_v57  ;;  %v305_v50 = vmul.f32 0.33333334, %v304_v44 }
 0x4a0   :  { %v401_v60 = vsub.f32 1.5, %v400_v58  ;;  %531 = vrsqrt.f32 %v295_v9  ;;  %vm313_vm5 = vcmp.eq.f32.partialorder %v295_v9, inf  ;;  %v316_v35 = vand.u32 2147483648, %v295_v9 }
 0x4a1   :  { %v424_v61 = vsub.f32 1.5, %v423_v59  ;;  %vm315_vm12 = vcmp.eq.f32.partialorder %v295_v9, 0.0 }
 0x4a2   :  { %v402_v62 = vmul.f32 %v526_v52, %v401_v60 }
 0x4a3   :  { %v425_v63 = vmul.f32 %v528_v53, %v424_v61 }
 0x4a4   :  { %v403_v2 = vmul.f32 %v402_v62, %v396_v51 }
 0x4a5   :  { %v426_v4 = vmul.f32 %v425_v63, %v419_v6 }
 0x4a6   :  { %v405_v5 = vsel %vm404_vm15, %v396_v51, %v403_v2  ;;  %v532_v22 = vpop.eup %531  ;;  %vm456_vm15 = vcmp.eq.s32.totalorder %v697_v11, 7 }
 0x4a7   :  { %v408_v8 = vsel %vm406_vm0, %v407_v3, %v405_v5  ;;  %v428_v12 = vsel %vm427_vm1, %v419_v6, %v426_v4  ;;  %v307_v23 = vmul.f32 %v532_v22, %v295_v9  ;;  %vm458_vm0 = vcmp.eq.s32.totalorder %v697_v11, 8 }
 0x4a8   :  { %v431_v13 = vsel %vm429_vm3, %v430_v15, %v428_v12  ;;  %469 = vst.msk [vmem:[#allocation3 + $0x8] sm:$0x1] %vm468_vm14, %v408_v8  ;;  %s503_s6 = spop %502  ;;  %vm460_vm1 = vcmp.eq.s32.totalorder %v697_v11, 9  ;;  %vm463_vm3 = vcmp.eq.s32.totalorder %v697_v11, 10 }
 0x4a9   :  { %470 = vst.msk [vmem:[#allocation3 + $0x9] sm:$0x1] %vm468_vm14, %v431_v13  ;;  %v308_v26 = vmul.f32 %v532_v22, %v307_v23  ;;  %vm449_vm14 = vcmp.eq.s32.totalorder %v697_v11, 6  ;;  %s505_s15 = spop %504  ;;  %v461_v52 = vstv %s503_s6 }
 0x4aa   :  { %479 = vst.msk [vmem:[#allocation3 + $0x8] sm:$0xff] %vm477_vm2, %v474_v14  ;;  %v464_v54 = vstv %s505_s15 }
 0x4ab   :  { %v309_v27 = vmul.f32 0.5, %v308_v26 }
 0x4ad   :  { %v310_v29 = vsub.f32 1.5, %v309_v27 }
 0x4af   :  { %v311_v0 = vmul.f32 %v532_v22, %v310_v29 }
 0x4b1   :  { %v312_v34 = vmul.f32 %v311_v0, %v295_v9 }
 0x4b3   :  { %v314_v37 = vsel %vm313_vm5, %v295_v9, %v312_v34 }
 0x4b4   :  { %v317_v43 = vsel %vm315_vm12, %v316_v35, %v314_v37 }
 0x4e2   :  { %v446_v41 = vpop.permute.xlu1 %445 }
 0x4e4   :  { %v334_v24 = vpop.xlane.xlu2 %333 }
 0x4e5   :  { %v335_v25 = vmul.f32 0.5, %v334_v24 }
 0x4e7   :  { %533 = vrsqrt.f32 %v335_v25  ;;  %vm343_vm7 = vcmp.eq.f32.partialorder %v335_v25, inf  ;;  %v346_v38 = vand.u32 2147483648, %v335_v25  ;;  %vm345_vm9 = vcmp.eq.f32.partialorder %v335_v25, 0.0 }
 0x4e8   :  { %v435_v42 = vsel %vm434_vm6, %v335_v25, %v433_v39 }
 0x4ea   :  { %v472_v57 = vpop.permute.xlu1 %471 }
 0x4ec   :  { %v453_v48 = vpop.permute.xlu2 %452 }
 0x4ed   :  { %v534_v28 = vpop.eup %533 }
 0x4ee   :  { %v337_v30 = vmul.f32 %v534_v28, %v335_v25 }
 0x4f0   :  { %v338_v31 = vmul.f32 %v534_v28, %v337_v30 }
 0x4f2   :  { %v339_v32 = vmul.f32 0.5, %v338_v31 }
 0x4f4   :  { %v340_v33 = vsub.f32 1.5, %v339_v32 }
 0x4f6   :  { %v341_v1 = vmul.f32 %v534_v28, %v340_v33 }
 0x4f8   :  { %v342_v36 = vmul.f32 %v341_v1, %v335_v25 }
 0x4fa   :  { %v344_v20 = vsel %vm343_vm7, %v335_v25, %v342_v36 }
 0x4fb   :  { %v347_v10 = vsel %vm345_vm9, %v346_v38, %v344_v20 }
 0x4fc   :  { %v437_v45 = vsel %vm436_vm8, %v347_v10, %v435_v42 }
 0x4fd   :  { %v439_v46 = vsel %vm438_vm10, %v295_v9, %v437_v45 }
 0x4fe   :  { %v441_v7 = vsel %vm440_vm11, %v317_v43, %v439_v46 }
 0x4ff   :  { %v448_v49 = vsel %vm442_vm13, %v446_v41, %v441_v7 }
 0x500   :  { %v455_v51 = vsel %vm449_vm14, %v453_v48, %v448_v49 }
 0x501   :  { %v457_v6 = vsel %vm456_vm15, %v300_v47, %v455_v51 }
 0x502   :  { %v459_v53 = vsel %vm458_vm0, %v305_v50, %v457_v6 }
 0x503   :  { %v462_v55 = vsel %vm460_vm1, %v461_v52, %v459_v53 }
 0x504   :  { %v465_v56 = vsel %vm463_vm3, %v464_v54, %v462_v55 }
 0x505   :  { %466 = vst [vmem:[#allocation3] sm:$0xff] %v465_v56 }
 0x506   :  { %478 = vst.msk [vmem:[#allocation3] sm:$0xff] %vm477_vm2, %v472_v57 }
 0x507   :  { %492 = dma.vmem_to_hbm [thread:$0]  %s485_s17, 256, %s487_s19, [#allocation4], %s572_s2, %s572_s2, %s563_s0  }
 0x508   :  { %559 = dma.done.wait [#allocation4], 256  }
 0x509   :  { %560 = vsyncadd [#allocation4], 4294967040 }
 0x50a   :  { %497 = vsyncpa [#allocation4], 1 }

</bundles_post_ra>
